<compile_context>
chip_gen: v5e
topology: v5e:2x2
jax: 0.10.0
libtpu: 0.0.40
codegen_flags: <defaults>
</compile_context>

<pallas_src>
import jax
import jax.numpy as jnp
from jax.experimental import pallas as pl
from jax.experimental.pallas import tpu as pltpu

HIDDEN = 100                   # logical feature width of the module
PAD = 128                      # lane-aligned padded width
N_HIDDEN_LAYERS = 5            # Linear+ReLU blocks before the final Linear
N_LAYERS = N_HIDDEN_LAYERS + 1
TILE_B_MAX = 4096              # rows per grid step (amortize ~0.35us/step)


def _round_up(n, m):
    return ((n + m - 1) // m) * m


def _mlp_kernel(x_ref, w_ref, b_ref, wl_ref, bl_ref, o_ref, h_scratch):
    # x_ref:  (tile_b, 100) f32         w_ref: (5, 128, 128) bf16
    # b_ref:  (5, 1, 128) f32           wl_ref: (1, 128) f32   bl_ref: (1, 1) f32
    # o_ref:  (tile_b, 1) f32           h_scratch: (tile_b, 128) bf16
    tile_b = x_ref.shape[0]

    # Lane-pad 100 -> 128 inside the kernel: write x (cast to bf16) into the
    # first 100 lanes of the scratch and zero the padded 28 lanes every step
    # (so each TensorCore's private scratch is always correctly initialized).
    h_scratch[:, :HIDDEN] = x_ref[...].astype(jnp.bfloat16)
    h_scratch[:, HIDDEN:] = jnp.zeros((tile_b, PAD - HIDDEN), jnp.bfloat16)

    h_bf16 = h_scratch[...]                       # (tile_b, 128) bf16
    h = None
    # 5 hidden layers: bf16 MXU matmul with f32 accumulation + f32 bias/ReLU.
    for layer in range(N_HIDDEN_LAYERS):
        z = jnp.dot(h_bf16, w_ref[layer], preferred_element_type=jnp.float32)
        h = jnp.maximum(z + b_ref[layer], 0.0)    # f32
        if layer + 1 < N_HIDDEN_LAYERS:
            h_bf16 = h.astype(jnp.bfloat16)

    # Final Linear(100, 1) as a VPU multiply + lane reduce (padded lanes of
    # both h and wl are exactly zero, so the reduction is exact).
    out = jnp.sum(h * wl_ref[...], axis=-1, keepdims=True) + bl_ref[...]
    o_ref[...] = out.astype(o_ref.dtype)


def _pack_params(params):
    """Pad hidden Ws to (128,128) bf16 / bs to (1,128) f32 and stack; final
    layer becomes a (1,128) f32 row and a (1,1) f32 bias."""
    ws, bs = [], []
    for layer in range(N_HIDDEN_LAYERS):
        w = params[2 * layer].astype(jnp.float32)          # (100, 100) (in,out)
        b = params[2 * layer + 1].astype(jnp.float32)      # (1, 100)
        w_pad = jnp.zeros((PAD, PAD), jnp.float32).at[:HIDDEN, :HIDDEN].set(w)
        b_pad = jnp.zeros((1, PAD), jnp.float32).at[:, :HIDDEN].set(b)
        ws.append(w_pad.astype(jnp.bfloat16))
        bs.append(b_pad)
    w_last = jnp.zeros((1, PAD), jnp.float32).at[:, :HIDDEN].set(
        params[2 * N_HIDDEN_LAYERS].astype(jnp.float32).reshape(1, HIDDEN))
    b_last = params[2 * N_HIDDEN_LAYERS + 1].astype(jnp.float32).reshape(1, 1)
    return jnp.stack(ws), jnp.stack(bs), w_last, b_last


@jax.jit
def deep_network_forward(x, params):
    """x: (B, 100); params: flat tuple (w1, b1, ..., w6, b6), W as (in, out),
    b as (1, out). Returns (B, 1) float32."""
    batch = x.shape[0]
    x = x.astype(jnp.float32)

    # Sublane minimum: pad tiny batches up to 8 rows (only materializes for B<8).
    rows = max(batch, 8)
    if rows != batch:
        x = jnp.pad(x, ((0, rows - batch), (0, 0)))

    # Grid: at least 2 even steps when possible (both TCs on v7x), capped tile.
    n_tiles = max(1, pl.cdiv(rows, TILE_B_MAX))
    if rows > 8:
        n_tiles = max(2, n_tiles)
        n_tiles += n_tiles % 2                      # even grid for 2 TCs
    tile_b = _round_up(pl.cdiv(rows, n_tiles), 8)
    n_tiles = pl.cdiv(rows, tile_b)

    w_stack, b_stack, w_last, b_last = _pack_params(params)

    out = pl.pallas_call(
        _mlp_kernel,
        out_shape=jax.ShapeDtypeStruct((rows, 1), jnp.float32),
        grid=(n_tiles,),
        in_specs=[
            pl.BlockSpec((tile_b, HIDDEN), lambda i: (i, 0)),           # x streams
            pl.BlockSpec((N_HIDDEN_LAYERS, PAD, PAD), lambda i: (0, 0, 0)),  # weights resident
            pl.BlockSpec((N_HIDDEN_LAYERS, 1, PAD), lambda i: (0, 0, 0)),    # biases resident
            pl.BlockSpec((1, PAD), lambda i: (0, 0)),                   # final weight row
            pl.BlockSpec((1, 1), lambda i: (0, 0)),                     # final bias
        ],
        out_specs=pl.BlockSpec((tile_b, 1), lambda i: (i, 0)),
        scratch_shapes=[pltpu.VMEM((tile_b, PAD), jnp.bfloat16)],
        compiler_params=pltpu.CompilerParams(
            dimension_semantics=("parallel",),      # shard batch over TCs (v7x)
            vmem_limit_bytes=32 << 20,              # actual footprint ~10 MiB
        ),
    )(x, w_stack, b_stack, w_last, b_last)

    return out[:batch] if rows != batch else out


def init_params(key):
    """Deterministic init mimicking PyTorch nn.Linear default (uniform +-1/sqrt(fan_in))."""
    dims = [(HIDDEN, HIDDEN)] * N_HIDDEN_LAYERS + [(HIDDEN, 1)]
    params = []
    for (fan_in, fan_out) in dims:
        key, kw, kb = jax.random.split(key, 3)
        bound = 1.0 / jnp.sqrt(jnp.float32(fan_in))
        w = jax.random.uniform(kw, (fan_in, fan_out), jnp.float32, -bound, bound)
        b = jax.random.uniform(kb, (1, fan_out), jnp.float32, -bound, bound)
        params.extend([w, b])
    return tuple(params)


def reference_forward(x, params):
    h = x.astype(jnp.float32)
    for layer in range(N_HIDDEN_LAYERS):
        h = jnp.maximum(h @ params[2 * layer] + params[2 * layer + 1], 0.0)
    return h @ params[2 * N_HIDDEN_LAYERS] + params[2 * N_HIDDEN_LAYERS + 1]


def _assert_close(out, ref, name):
    # bf16 MXU operands through a 6-layer chain -> looser tolerance than f32.
    err = float(jnp.max(jnp.abs(out - ref)))
    scale = float(jnp.max(jnp.abs(ref)))
    assert err <= 1e-2 + 3e-2 * scale, (
        f"{name}: max|err|={err:.3e} vs scale={scale:.3e}")


if __name__ == "__main__":
    key = jax.random.PRNGKey(0)
    key, kx1, kx2 = jax.random.split(key, 3)
    params = init_params(key)

    # Small case (matches the module's implied shapes).
    x_small = jax.random.normal(kx1, (8, HIDDEN), jnp.float32)
    out_small = deep_network_forward(x_small, params)
    jax.block_until_ready(out_small)
    assert out_small.shape == (8, 1)
    _assert_close(out_small, reference_forward(x_small, params), "small")

    # Exercise the batch grid (2 tiles) + uneven tail rows.
    x_big = jax.random.normal(kx2, (300, HIDDEN), jnp.float32)
    out_big = deep_network_forward(x_big, params)
    jax.block_until_ready(out_big)
    assert out_big.shape == (300, 1)
    _assert_close(out_big, reference_forward(x_big, params), "big")

    print("KERNEL_OK")
</pallas_src>

<mosaic_0001>
module attributes {stable_mosaic.version = 11 : i64} {
  func.func @_mlp_kernel(%arg0: i32, %arg1: memref<8x100xf32, #tpu.memory_space<vmem>>, %arg2: memref<5x128x128xbf16, #tpu.memory_space<vmem>>, %arg3: memref<5x1x128xf32, #tpu.memory_space<vmem>>, %arg4: memref<1x128xf32, #tpu.memory_space<vmem>>, %arg5: memref<1x1xf32, #tpu.memory_space<vmem>>, %arg6: memref<8x1xf32, #tpu.memory_space<vmem>>, %arg7: memref<8x128xbf16, #tpu.memory_space<vmem>>) attributes {dimension_semantics = [#tpu.dimension_semantics<parallel>], iteration_bounds = array<i64: 1>, scalar_prefetch = 0 : i64, scratch_operands = 1 : i64, tpu.core_type = #tpu.core_type<tc>, window_params = [{transform_indices = @transform_0, window_bounds = array<i64: 8, 100>}, {pipeline_mode = #tpu.pipeline_mode<synchronous>, transform_indices = @transform_1, window_bounds = array<i64: 5, 128, 128>}, {pipeline_mode = #tpu.pipeline_mode<synchronous>, transform_indices = @transform_2, window_bounds = array<i64: 5, 1, 128>}, {pipeline_mode = #tpu.pipeline_mode<synchronous>, transform_indices = @transform_3, window_bounds = array<i64: 1, 128>}, {pipeline_mode = #tpu.pipeline_mode<synchronous>, transform_indices = @transform_4, window_bounds = array<i64: 1, 1>}, {transform_indices = @transform_5, window_bounds = array<i64: 8, 1>}]} {
    %c0 = arith.constant 0 : index
    %c0_0 = arith.constant 0 : index
    %0 = vector.load %arg1[%c0, %c0_0] : memref<8x100xf32, #tpu.memory_space<vmem>>, vector<8x100xf32>
    %1 = arith.truncf %0 : vector<8x100xf32> to vector<8x100xbf16>
    %c0_1 = arith.constant 0 : index
    %c0_2 = arith.constant 0 : index
    %2 = vector.load %arg7[%c0_1, %c0_2] : memref<8x128xbf16, #tpu.memory_space<vmem>>, vector<8x100xbf16>
    tpu.vector_store %arg7[%c0_1, %c0_2], %1 {strides = array<i32>} : memref<8x128xbf16, #tpu.memory_space<vmem>>, vector<8x100xbf16>,
    %cst = arith.constant 0.000000e+00 : bf16
    %3 = vector.broadcast %cst : bf16 to vector<8x28xbf16>
    %c0_3 = arith.constant 0 : index
    %c100 = arith.constant 100 : index
    %4 = vector.load %arg7[%c0_3, %c100] : memref<8x128xbf16, #tpu.memory_space<vmem>>, vector<8x28xbf16>
    tpu.vector_store %arg7[%c0_3, %c100], %3 {strides = array<i32>} : memref<8x128xbf16, #tpu.memory_space<vmem>>, vector<8x28xbf16>,
    %c0_4 = arith.constant 0 : index
    %c0_5 = arith.constant 0 : index
    %5 = vector.load %arg7[%c0_4, %c0_5] : memref<8x128xbf16, #tpu.memory_space<vmem>>, vector<8x128xbf16>
    %c0_6 = arith.constant 0 : index
    %c0_7 = arith.constant 0 : index
    %c0_8 = arith.constant 0 : index
    %6 = vector.load %arg2[%c0_6, %c0_7, %c0_8] : memref<5x128x128xbf16, #tpu.memory_space<vmem>>, vector<1x128x128xbf16>
    %7 = vector.shape_cast %6 : vector<1x128x128xbf16> to vector<128x128xbf16>
    %cst_9 = arith.constant dense<0.000000e+00> : vector<8x128xf32>
    %8 = tpu.matmul %5, %7, %cst_9 {dimension_numbers = #tpu.dot_dimension_numbers<[1], [0], [0], [1], [0, 0, 1, 1], [], []>} : vector<8x128xbf16>, vector<128x128xbf16>, vector<8x128xf32> -> vector<8x128xf32>
    %c0_10 = arith.constant 0 : index
    %c0_11 = arith.constant 0 : index
    %c0_12 = arith.constant 0 : index
    %9 = vector.load %arg3[%c0_10, %c0_11, %c0_12] : memref<5x1x128xf32, #tpu.memory_space<vmem>>, vector<1x1x128xf32>
    %10 = vector.shape_cast %9 : vector<1x1x128xf32> to vector<1x128xf32>
    %11 = vector.broadcast %10 : vector<1x128xf32> to vector<8x128xf32>
    %12 = arith.addf %8, %11 : vector<8x128xf32>
    %cst_13 = arith.constant 0.000000e+00 : f32
    %13 = vector.broadcast %cst_13 : f32 to vector<8x128xf32>
    %14 = arith.maximumf %12, %13 : vector<8x128xf32>
    %15 = arith.truncf %14 : vector<8x128xf32> to vector<8x128xbf16>
    %c1 = arith.constant 1 : index
    %c0_14 = arith.constant 0 : index
    %c0_15 = arith.constant 0 : index
    %16 = vector.load %arg2[%c1, %c0_14, %c0_15] : memref<5x128x128xbf16, #tpu.memory_space<vmem>>, vector<1x128x128xbf16>
    %17 = vector.shape_cast %16 : vector<1x128x128xbf16> to vector<128x128xbf16>
    %cst_16 = arith.constant dense<0.000000e+00> : vector<8x128xf32>
    %18 = tpu.matmul %15, %17, %cst_16 {dimension_numbers = #tpu.dot_dimension_numbers<[1], [0], [0], [1], [0, 0, 1, 1], [], []>} : vector<8x128xbf16>, vector<128x128xbf16>, vector<8x128xf32> -> vector<8x128xf32>
    %c1_17 = arith.constant 1 : index
    %c0_18 = arith.constant 0 : index
    %c0_19 = arith.constant 0 : index
    %19 = vector.load %arg3[%c1_17, %c0_18, %c0_19] : memref<5x1x128xf32, #tpu.memory_space<vmem>>, vector<1x1x128xf32>
    %20 = vector.shape_cast %19 : vector<1x1x128xf32> to vector<1x128xf32>
    %21 = vector.broadcast %20 : vector<1x128xf32> to vector<8x128xf32>
    %22 = arith.addf %18, %21 : vector<8x128xf32>
    %cst_20 = arith.constant 0.000000e+00 : f32
    %23 = vector.broadcast %cst_20 : f32 to vector<8x128xf32>
    %24 = arith.maximumf %22, %23 : vector<8x128xf32>
    %25 = arith.truncf %24 : vector<8x128xf32> to vector<8x128xbf16>
    %c2 = arith.constant 2 : index
    %c0_21 = arith.constant 0 : index
    %c0_22 = arith.constant 0 : index
    %26 = vector.load %arg2[%c2, %c0_21, %c0_22] : memref<5x128x128xbf16, #tpu.memory_space<vmem>>, vector<1x128x128xbf16>
    %27 = vector.shape_cast %26 : vector<1x128x128xbf16> to vector<128x128xbf16>
    %cst_23 = arith.constant dense<0.000000e+00> : vector<8x128xf32>
    %28 = tpu.matmul %25, %27, %cst_23 {dimension_numbers = #tpu.dot_dimension_numbers<[1], [0], [0], [1], [0, 0, 1, 1], [], []>} : vector<8x128xbf16>, vector<128x128xbf16>, vector<8x128xf32> -> vector<8x128xf32>
    %c2_24 = arith.constant 2 : index
    %c0_25 = arith.constant 0 : index
    %c0_26 = arith.constant 0 : index
    %29 = vector.load %arg3[%c2_24, %c0_25, %c0_26] : memref<5x1x128xf32, #tpu.memory_space<vmem>>, vector<1x1x128xf32>
    %30 = vector.shape_cast %29 : vector<1x1x128xf32> to vector<1x128xf32>
    %31 = vector.broadcast %30 : vector<1x128xf32> to vector<8x128xf32>
    %32 = arith.addf %28, %31 : vector<8x128xf32>
    %cst_27 = arith.constant 0.000000e+00 : f32
    %33 = vector.broadcast %cst_27 : f32 to vector<8x128xf32>
    %34 = arith.maximumf %32, %33 : vector<8x128xf32>
    %35 = arith.truncf %34 : vector<8x128xf32> to vector<8x128xbf16>
    %c3 = arith.constant 3 : index
    %c0_28 = arith.constant 0 : index
    %c0_29 = arith.constant 0 : index
    %36 = vector.load %arg2[%c3, %c0_28, %c0_29] : memref<5x128x128xbf16, #tpu.memory_space<vmem>>, vector<1x128x128xbf16>
    %37 = vector.shape_cast %36 : vector<1x128x128xbf16> to vector<128x128xbf16>
    %cst_30 = arith.constant dense<0.000000e+00> : vector<8x128xf32>
    %38 = tpu.matmul %35, %37, %cst_30 {dimension_numbers = #tpu.dot_dimension_numbers<[1], [0], [0], [1], [0, 0, 1, 1], [], []>} : vector<8x128xbf16>, vector<128x128xbf16>, vector<8x128xf32> -> vector<8x128xf32>
    %c3_31 = arith.constant 3 : index
    %c0_32 = arith.constant 0 : index
    %c0_33 = arith.constant 0 : index
    %39 = vector.load %arg3[%c3_31, %c0_32, %c0_33] : memref<5x1x128xf32, #tpu.memory_space<vmem>>, vector<1x1x128xf32>
    %40 = vector.shape_cast %39 : vector<1x1x128xf32> to vector<1x128xf32>
    %41 = vector.broadcast %40 : vector<1x128xf32> to vector<8x128xf32>
    %42 = arith.addf %38, %41 : vector<8x128xf32>
    %cst_34 = arith.constant 0.000000e+00 : f32
    %43 = vector.broadcast %cst_34 : f32 to vector<8x128xf32>
    %44 = arith.maximumf %42, %43 : vector<8x128xf32>
    %45 = arith.truncf %44 : vector<8x128xf32> to vector<8x128xbf16>
    %c4 = arith.constant 4 : index
    %c0_35 = arith.constant 0 : index
    %c0_36 = arith.constant 0 : index
    %46 = vector.load %arg2[%c4, %c0_35, %c0_36] : memref<5x128x128xbf16, #tpu.memory_space<vmem>>, vector<1x128x128xbf16>
    %47 = vector.shape_cast %46 : vector<1x128x128xbf16> to vector<128x128xbf16>
    %cst_37 = arith.constant dense<0.000000e+00> : vector<8x128xf32>
    %48 = tpu.matmul %45, %47, %cst_37 {dimension_numbers = #tpu.dot_dimension_numbers<[1], [0], [0], [1], [0, 0, 1, 1], [], []>} : vector<8x128xbf16>, vector<128x128xbf16>, vector<8x128xf32> -> vector<8x128xf32>
    %c4_38 = arith.constant 4 : index
    %c0_39 = arith.constant 0 : index
    %c0_40 = arith.constant 0 : index
    %49 = vector.load %arg3[%c4_38, %c0_39, %c0_40] : memref<5x1x128xf32, #tpu.memory_space<vmem>>, vector<1x1x128xf32>
    %50 = vector.shape_cast %49 : vector<1x1x128xf32> to vector<1x128xf32>
    %51 = vector.broadcast %50 : vector<1x128xf32> to vector<8x128xf32>
    %52 = arith.addf %48, %51 : vector<8x128xf32>
    %cst_41 = arith.constant 0.000000e+00 : f32
    %53 = vector.broadcast %cst_41 : f32 to vector<8x128xf32>
    %54 = arith.maximumf %52, %53 : vector<8x128xf32>
    %c0_42 = arith.constant 0 : index
    %c0_43 = arith.constant 0 : index
    %55 = vector.load %arg4[%c0_42, %c0_43] : memref<1x128xf32, #tpu.memory_space<vmem>>, vector<1x128xf32>
    %56 = vector.broadcast %55 : vector<1x128xf32> to vector<8x128xf32>
    %57 = arith.mulf %54, %56 : vector<8x128xf32>
    %cst_44 = arith.constant dense<0.000000e+00> : vector<8xf32>
    %58 = vector.multi_reduction <add>, %57, %cst_44 [1] : vector<8x128xf32> to vector<8xf32>
    %59 = vector.shape_cast %58 : vector<8xf32> to vector<8x1xf32>
    %c0_45 = arith.constant 0 : index
    %c0_46 = arith.constant 0 : index
    %60 = vector.load %arg5[%c0_45, %c0_46] : memref<1x1xf32, #tpu.memory_space<vmem>>, vector<1x1xf32>
    %61 = vector.broadcast %60 : vector<1x1xf32> to vector<8x1xf32>
    %62 = arith.addf %59, %61 : vector<8x1xf32>
    %c0_47 = arith.constant 0 : index
    %c0_48 = arith.constant 0 : index
    %63 = vector.load %arg6[%c0_47, %c0_48] : memref<8x1xf32, #tpu.memory_space<vmem>>, vector<8x1xf32>
    tpu.vector_store %arg6[%c0_47, %c0_48], %62 {strides = array<i32>} : memref<8x1xf32, #tpu.memory_space<vmem>>, vector<8x1xf32>,
    return
  }
  func.func @transform_0(%arg0: i32) -> (i32, i32) {
    %c0_i32 = arith.constant 0 : i32
    %c0_i32_0 = arith.constant 0 : i32
    return %arg0, %c0_i32 : i32, i32
  }
  func.func @transform_1(%arg0: i32) -> (i32, i32, i32) {
    %c0_i32 = arith.constant 0 : i32
    %c0_i32_0 = arith.constant 0 : i32
    %c0_i32_1 = arith.constant 0 : i32
    %c0_i32_2 = arith.constant 0 : i32
    return %c0_i32, %c0_i32_0, %c0_i32_1 : i32, i32, i32
  }
  func.func @transform_2(%arg0: i32) -> (i32, i32, i32) {
    %c0_i32 = arith.constant 0 : i32
    %c0_i32_0 = arith.constant 0 : i32
    %c0_i32_1 = arith.constant 0 : i32
    %c0_i32_2 = arith.constant 0 : i32
    return %c0_i32, %c0_i32_0, %c0_i32_1 : i32, i32, i32
  }
  func.func @transform_3(%arg0: i32) -> (i32, i32) {
    %c0_i32 = arith.constant 0 : i32
    %c0_i32_0 = arith.constant 0 : i32
    %c0_i32_1 = arith.constant 0 : i32
    return %c0_i32, %c0_i32_0 : i32, i32
  }
  func.func @transform_4(%arg0: i32) -> (i32, i32) {
    %c0_i32 = arith.constant 0 : i32
    %c0_i32_0 = arith.constant 0 : i32
    %c0_i32_1 = arith.constant 0 : i32
    return %c0_i32, %c0_i32_0 : i32, i32
  }
  func.func @transform_5(%arg0: i32) -> (i32, i32) {
    %c0_i32 = arith.constant 0 : i32
    %c0_i32_0 = arith.constant 0 : i32
    return %arg0, %c0_i32 : i32, i32
  }
}

</mosaic_0001>

<bundles_post_ra>
// kernel: deep_network_forward.1
= control target key start
LH: loop header
LB: loop body
LE: loop exit
PB: predicated region body
PF: predicated region fallthrough
CT: control target
= control target key end

     0   :  { %vm25_vm0 = vcmask 814080   ;;  %vm27_vm1 = vcmask 1044256   ;;  %v746_v7 = vmov 0   ;;  %vm464_vm2 = vcmask 7168   ;;  %s924_s1 = inlined_call_operand.vmem [shape: bf16[5,128,128], index: 1, kind: input, shape index: {}]   ;;  %s925_s0 = inlined_call_operand.vmem [shape: f32[8,100], index: 0, kind: input, shape index: {}]   ;;  %s926_s2 = inlined_call_operand.vmem [shape: f32[5,1,128], index: 2, kind: input, shape index: {}]   ;;  %s927_s3 = inlined_call_operand.vmem [shape: f32[1,128], index: 3, kind: input, shape index: {}]   ;;  %s928_s4 = inlined_call_operand.<no memory space> [shape: f32[1,1], index: 4, kind: input, shape index: {}]   ;;  %s929_s5 = inlined_call_operand.vmem [shape: f32[8,1], index: 5, kind: output, shape index: {}]  }
   0x1   :  { %v705_v0 = vld [vmem:[%s924_s1 + $0x38] sm:$0xff]  ;;  %v704_v1 = vld [vmem:[%s924_s1 + $0x30] sm:$0xff]  ;;  %v23_v2 = vld [vmem:[%s925_s0] sm:$0xff] }
   0x2   :  { %98 = vmatpush.bf16.msra.mxu0 %v705_v0  ;;  %v24_v3 = vpack.c.bf16 %v23_v2, %v23_v2  ;;  %v713_v4 = vld [vmem:[%s924_s1 + $0x78] sm:$0xff]  ;;  %v703_v5 = vld [vmem:[%s924_s1 + $0x28] sm:$0xff]  ;;  %v712_v6 = vld [vmem:[%s924_s1 + $0x70] sm:$0xff] }
   0x3   :  { %183 = vmatpush.bf16.msra.mxu1 %v713_v4  ;;  %v711_v8 = vld [vmem:[%s924_s1 + $0x68] sm:$0xff]  ;;  %v702_v9 = vld [vmem:[%s924_s1 + $0x20] sm:$0xff]  ;;  %v701_v11 = vld [vmem:[%s924_s1 + $0x18] sm:$0xff]  ;;  %v10_v4 = vstv %s928_s4 }
   0x4   :  { %26 = vst.msk [vmem:[#allocation2] sm:$0xf] %vm25_vm0, %v24_v3  ;;  %v710_v10 = vld [vmem:[%s924_s1 + $0x60] sm:$0xff]  ;;  %v709_v12 = vld [vmem:[%s924_s1 + $0x58] sm:$0xff]  ;;  %v700_v13 = vld [vmem:[%s924_s1 + $0x10] sm:$0xff] }
   0x5   :  { %28 = vst.msk [vmem:[#allocation2] sm:$0xf] %vm27_vm1, %v746_v7  ;;  %v708_v14 = vld [vmem:[%s924_s1 + $0x50] sm:$0xff]  ;;  %v699_v15 = vld [vmem:[%s924_s1 + $0x8] sm:$0xff]  ;;  %v698_v16 = vld [vmem:[%s924_s1] sm:$0xff] }
   0x6   :  { %99 = vmatpush.bf16.msra.mxu0 %v704_v1  ;;  %v707_v18 = vld [vmem:[%s924_s1 + $0x48] sm:$0xff]  ;;  %v706_v19 = vld [vmem:[%s924_s1 + $0x40] sm:$0xff]  ;;  %v721_v20 = vld [vmem:[%s924_s1 + $0xb8] sm:$0xff]  ;;  %11 = vst [vmem:[#allocation3] sm:$0x1] %v10_v4 }
   0x7   :  { %184 = vmatpush.bf16.msra.mxu1 %v712_v6  ;;  %268 = vmatpush.bf16.msra.mxu2 %v721_v20  ;;  %v720_v21 = vld [vmem:[%s924_s1 + $0xb0] sm:$0xff]  ;;  %v719_v22 = vld [vmem:[%s924_s1 + $0xa8] sm:$0xff]  ;;  %v718_v23 = vld [vmem:[%s924_s1 + $0xa0] sm:$0xff] }
   0x8   :  { %v717_v24 = vld [vmem:[%s924_s1 + $0x98] sm:$0xff]  ;;  %v716_v25 = vld [vmem:[%s924_s1 + $0x90] sm:$0xff]  ;;  %v739_v26 = vld [vmem:[%s926_s2] ss:$0 sm:$0xff] }
   0x9   :  { %v715_v32 = vld [vmem:[%s924_s1 + $0x88] sm:$0xff]  ;;  %v714_v33 = vld [vmem:[%s924_s1 + $0x80] sm:$0xff]  ;;  %v729_v34 = vld [vmem:[%s924_s1 + $0xf8] sm:$0xff] }
   0xa   :  { %100 = vmatpush.bf16.msra.mxu0 %v703_v5  ;;  %353 = vmatpush.bf16.msra.mxu3 %v729_v34  ;;  %v728_v35 = vld [vmem:[%s924_s1 + $0xf0] sm:$0xff]  ;;  %v727_v36 = vld [vmem:[%s924_s1 + $0xe8] sm:$0xff]  ;;  %v726_v37 = vld [vmem:[%s924_s1 + $0xe0] sm:$0xff] }
   0xb   :  { %185 = vmatpush.bf16.msra.mxu1 %v711_v8  ;;  %269 = vmatpush.bf16.msra.mxu2 %v720_v21  ;;  %v725_v38 = vld [vmem:[%s924_s1 + $0xd8] sm:$0xff]  ;;  %v724_v39 = vld [vmem:[%s924_s1 + $0xd0] sm:$0xff]  ;;  %v740_v40 = vld [vmem:[%s926_s2 + $0x1] ss:$0 sm:$0xff] }
   0xc   :  { %v29_v17 = vld [vmem:[#allocation2] sm:$0xf]  ;;  %v723_v46 = vld [vmem:[%s924_s1 + $0xc8] sm:$0xff]  ;;  %v737_v48 = vld [vmem:[%s924_s1 + $0x138] sm:$0xff] }
   0xd   :  { %v722_v47 = vld [vmem:[%s924_s1 + $0xc0] sm:$0xff]  ;;  %v736_v49 = vld [vmem:[%s924_s1 + $0x130] sm:$0xff]  ;;  %v735_v50 = vld [vmem:[%s924_s1 + $0x128] sm:$0xff] }
   0xe   :  { %101 = vmatpush.bf16.msra.mxu0 %v702_v9  ;;  %354 = vmatpush.bf16.msra.mxu3 %v728_v35  ;;  %v734_v51 = vld [vmem:[%s924_s1 + $0x120] sm:$0xff]  ;;  %v733_v52 = vld [vmem:[%s924_s1 + $0x118] sm:$0xff]  ;;  %v732_v53 = vld [vmem:[%s924_s1 + $0x110] sm:$0xff] }
   0xf   :  { %186 = vmatpush.bf16.msra.mxu1 %v710_v10  ;;  %270 = vmatpush.bf16.msra.mxu2 %v719_v22  ;;  %v741_v54 = vld [vmem:[%s926_s2 + $0x2] ss:$0 sm:$0xff]  ;;  %v731_v60 = vld [vmem:[%s924_s1 + $0x108] sm:$0xff]  ;;  %v742_v62 = vld [vmem:[%s926_s2 + $0x3] ss:$0 sm:$0xff] }
  0x10   :  { %v730_v61 = vld [vmem:[%s924_s1 + $0x100] sm:$0xff] }
  0x11   :  { %v743_v5 = vld [vmem:[%s926_s2 + $0x4] ss:$0 sm:$0xff]  ;;  %v744_v8 = vld [vmem:[%s927_s3] ss:$0 sm:$0xff] }
  0x12   :  { %102 = vmatpush.bf16.msra.mxu0 %v701_v11  ;;  %355 = vmatpush.bf16.msra.mxu3 %v727_v36 }
  0x13   :  { %187 = vmatpush.bf16.msra.mxu1 %v709_v12  ;;  %271 = vmatpush.bf16.msra.mxu2 %v718_v23  ;;  %v745_v12 = vld [vmem:[#allocation3] ss:$0 sm:$0xff] }
  0x16   :  { %103 = vmatpush.bf16.msra.mxu0 %v700_v13  ;;  %356 = vmatpush.bf16.msra.mxu3 %v726_v37 }
  0x17   :  { %188 = vmatpush.bf16.msra.mxu1 %v708_v14  ;;  %272 = vmatpush.bf16.msra.mxu2 %v717_v24 }
  0x1a   :  { %104 = vmatpush.bf16.msra.mxu0 %v699_v15  ;;  %357 = vmatpush.bf16.msra.mxu3 %v725_v38 }
  0x1b   :  { %189 = vmatpush.bf16.msra.mxu1 %v707_v18  ;;  %273 = vmatpush.bf16.msra.mxu2 %v716_v25 }
  0x1e   :  { %105 = vmatpush.bf16.msra.mxu0 %v698_v16  ;;  %358 = vmatpush.bf16.msra.mxu3 %v724_v39 }
  0x1f   :  { %190 = vmatpush.bf16.msra.mxu1 %v706_v19  ;;  %274 = vmatpush.bf16.msra.mxu2 %v715_v32 }
  0x21   :  { %106 = vmatmul.bf16.vlgmr.msra.gmra.mxu0 %v29_v17 }
  0x22   :  { %359 = vmatpush.bf16.msra.mxu3 %v723_v46  ;;  %438 = vmatpush.bf16.msrb.mxu0 %v737_v48 }
  0x23   :  { %275 = vmatpush.bf16.msra.mxu2 %v714_v33 }
  0x26   :  { %360 = vmatpush.bf16.msra.mxu3 %v722_v47  ;;  %439 = vmatpush.bf16.msrb.mxu0 %v736_v49 }
  0x2a   :  { %440 = vmatpush.bf16.msrb.mxu0 %v735_v50 }
  0x2e   :  { %441 = vmatpush.bf16.msrb.mxu0 %v734_v51 }
  0x32   :  { %442 = vmatpush.bf16.msrb.mxu0 %v733_v52 }
  0x36   :  { %443 = vmatpush.bf16.msrb.mxu0 %v732_v53 }
  0x3a   :  { %444 = vmatpush.bf16.msrb.mxu0 %v731_v60 }
  0x3e   :  { %445 = vmatpush.bf16.msrb.mxu0 %v730_v61 }
  0x9e   :  { %v107_v27 = vpop.f32.mrf.mxu0 }
  0x9f   :  { %v108_v28 = vadd.f32 %v739_v26, %v107_v27 }
  0xa1   :  { %v111_v29 = vmax.f32 %v108_v28, 0.0 }
  0xa3   :  { %v112_v30 = vpack.c.bf16 %v111_v29, %v111_v29 }
  0xa5   :  { %191 = vmatmul.bf16.vlgmr.msra.gmra.mxu1 %v112_v30 }
  0xa6   :  { %v109_v31 = vpop.f32.mrf.mxu0 }
 0x122   :  { %v192_v41 = vpop.f32.mrf.mxu1 }
 0x123   :  { %v193_v42 = vadd.f32 %v740_v40, %v192_v41 }
 0x125   :  { %v196_v43 = vmax.f32 %v193_v42, 0.0 }
 0x127   :  { %v197_v44 = vpack.c.bf16 %v196_v43, %v196_v43 }
 0x129   :  { %276 = vmatmul.bf16.vlgmr.msra.gmra.mxu2 %v197_v44 }
 0x12a   :  { %v194_v45 = vpop.f32.mrf.mxu1 }
 0x1ac   :  { %v277_v55 = vpop.f32.mrf.mxu2 }
 0x1ad   :  { %v278_v56 = vadd.f32 %v741_v54, %v277_v55 }
 0x1af   :  { %v281_v57 = vmax.f32 %v278_v56, 0.0 }
 0x1b1   :  { %v282_v58 = vpack.c.bf16 %v281_v57, %v281_v57 }
 0x1b3   :  { %361 = vmatmul.bf16.vlgmr.msra.gmra.mxu3 %v282_v58 }
 0x1b4   :  { %v279_v59 = vpop.f32.mrf.mxu2 }
 0x236   :  { %v362_v63 = vpop.f32.mrf.mxu3 }
 0x237   :  { %v363_v0 = vadd.f32 %v742_v62, %v362_v63 }
 0x239   :  { %v366_v1 = vmax.f32 %v363_v0, 0.0 }
 0x23b   :  { %v367_v2 = vpack.c.bf16 %v366_v1, %v366_v1 }
 0x23d   :  { %446 = vmatmul.bf16.vlgmr.msrb.gmra.mxu0 %v367_v2 }
 0x23e   :  { %v364_v3 = vpop.f32.mrf.mxu3 }
 0x2ba   :  { %v447_v6 = vpop.f32.mrf.mxu0 }
 0x2bb   :  { %v448_v7 = vadd.f32 %v743_v5, %v447_v6 }
 0x2bd   :  { %v451_v9 = vmax.f32 %v448_v7, 0.0 }
 0x2bf   :  { %v456_v10 = vmul.f32 %v744_v8, %v451_v9 }
 0x2c1   :  { %457 = vadd.xlane.f32.xlu0 %v456_v10 }
 0x2c2   :  { %v449_v11 = vpop.f32.mrf.mxu0 }
 0x334   :  { %v458_v13 = vpop.xlane.xlu0 %457 }
 0x335   :  { %v463_v14 = vadd.f32 %v745_v12, %v458_v13 }
 0x337   :  { %465 = vst.msk [vmem:[%s929_s5] sm:$0xff] %vm464_vm2, %v463_v14 }

</bundles_post_ra>
